<compile_context>
chip_gen: v5e
topology: v5e:2x2
jax: 0.10.0
libtpu: 0.0.40
codegen_flags: <defaults>
</compile_context>

<pallas_src>
import functools

import jax
import jax.numpy as jnp
from jax.experimental import pallas as pl
from jax.experimental.pallas import tpu as pltpu

_EPS = 1e-5
_VMEM_LIMIT = 48 * 1024 * 1024    # < 64 MiB v7x physical; ample headroom on v5e/v6e (128 MiB)
_TILE_BUDGET = 20 * 1024 * 1024   # estimated in-flight VMEM per block (dbl-buffered I/O + f32 temps)
_ROW_TILE_CAP = 4096
_MIN_GRID_STEPS = 4               # >= 2 grid steps per TensorCore after v7x megacore sharding

_CPARAMS = pltpu.CompilerParams(
    dimension_semantics=("parallel",),
    vmem_limit_bytes=_VMEM_LIMIT,
)


def _ln_rows_kernel(x_ref, w_ref, b_ref, o_ref):
    """Standard path: block = (row_tile, C); reduce over the lane (last) axis."""
    x = x_ref[...].astype(jnp.float32)
    mu = jnp.mean(x, axis=-1, keepdims=True)
    xm = x - mu                                    # bound once, reused below
    var = jnp.mean(xm * xm, axis=-1, keepdims=True)
    inv = jax.lax.rsqrt(var + _EPS)                # EUP slot (free-ish)
    o_ref[...] = (xm * inv * w_ref[...] + b_ref[...]).astype(o_ref.dtype)


def _seg_sum(v, seg):
    """Segment sums of an f32 value against a 0/1 bf16 block-diagonal reducer.

    2-term hi/lo bf16 split -> two single-pass MXU matmuls with f32 accumulation
    (same pushed RHS, independent LHS, so they pipeline). Relative error ~2^-16,
    far cheaper than Precision.HIGHEST's ~6-pass f32 emulation.
    """
    hi = v.astype(jnp.bfloat16)
    lo = (v - hi.astype(jnp.float32)).astype(jnp.bfloat16)
    return (jnp.dot(hi, seg, preferred_element_type=jnp.float32)
            + jnp.dot(lo, seg, preferred_element_type=jnp.float32))


def _ln_packed_kernel(x_ref, w_ref, b_ref, seg_ref, o_ref, *, inv_c):
    """Lane-dense path for small C: g = 128 // C logical rows per 128-lane row.

    Per-segment sums come from a (128,128) 0/1 block-diagonal matmul on the MXU
    (idle in this HBM-bound kernel), keeping all loads/stores unmasked.
    """
    x = x_ref[...].astype(jnp.float32)
    seg = seg_ref[...]                                  # bf16 0/1 reducer
    mu = _seg_sum(x, seg) * inv_c
    xm = x - mu
    var = _seg_sum(xm * xm, seg) * inv_c                # two-moment form (cancellation-safe)
    inv = jax.lax.rsqrt(var + _EPS)
    o_ref[...] = (xm * inv * w_ref[...] + b_ref[...]).astype(o_ref.dtype)


def _pick_row_tile(n_rows, c, dtype, *, f32_temps=4):
    """Largest aligned row tile whose estimated in-flight VMEM stays under budget,
    while keeping at least _MIN_GRID_STEPS grid steps when the row count permits."""
    itemsize = jnp.dtype(dtype).itemsize
    sub = max(8, 32 // itemsize)                  # 8 for f32, 16 for bf16, 32 for 8-bit
    # ~double-buffered input + output in `dtype` plus ~f32_temps f32 temporaries per row.
    bytes_per_row = c * (4 * itemsize + f32_temps * 4)
    rt = max(sub, (_TILE_BUDGET // max(bytes_per_row, 1)) // sub * sub)
    rt = min(rt, _ROW_TILE_CAP)
    padded_rows = -(-n_rows // sub) * sub
    rt = min(rt, padded_rows)
    if n_rows > _MIN_GRID_STEPS * sub:            # guarantee >= _MIN_GRID_STEPS steps
        per_step = max(sub, (n_rows // _MIN_GRID_STEPS) // sub * sub)
        rt = min(rt, per_step)
    return int(max(rt, sub))


def _rows_call(x2, w32, b32, row_tile=None):
    N, C = x2.shape
    rt = int(row_tile) if row_tile is not None else _pick_row_tile(N, C, x2.dtype, f32_temps=4)
    return pl.pallas_call(
        _ln_rows_kernel,
        out_shape=jax.ShapeDtypeStruct((N, C), x2.dtype),
        grid_spec=pltpu.PrefetchScalarGridSpec(
            num_scalar_prefetch=0,
            grid=(pl.cdiv(N, rt),),
            in_specs=[
                pl.BlockSpec((rt, C), lambda i: (i, 0)),
                pl.BlockSpec((1, C), lambda i: (0, 0)),
                pl.BlockSpec((1, C), lambda i: (0, 0)),
            ],
            out_specs=pl.BlockSpec((rt, C), lambda i: (i, 0)),
        ),
        compiler_params=_CPARAMS,
    )(x2, w32.reshape(1, C), b32.reshape(1, C))


def _packed_call(x2, w32, b32, g, row_tile=None):
    N, C = x2.shape
    Np, Cp = N // g, 128
    xp = x2.reshape(Np, Cp)                       # contiguous -> metadata-only reshape
    wp = jnp.tile(w32, g).reshape(1, Cp)
    bp = jnp.tile(b32, g).reshape(1, Cp)
    row_seg = jax.lax.broadcasted_iota(jnp.int32, (Cp, Cp), 0) // C
    col_seg = jax.lax.broadcasted_iota(jnp.int32, (Cp, Cp), 1) // C
    seg = (row_seg == col_seg).astype(jnp.bfloat16)   # 0/1 block-diag reducer (exact in bf16)

    rt = int(row_tile) if row_tile is not None else _pick_row_tile(Np, Cp, x2.dtype, f32_temps=7)
    out = pl.pallas_call(
        functools.partial(_ln_packed_kernel, inv_c=1.0 / C),
        out_shape=jax.ShapeDtypeStruct((Np, Cp), x2.dtype),
        grid_spec=pltpu.PrefetchScalarGridSpec(
            num_scalar_prefetch=0,
            grid=(pl.cdiv(Np, rt),),
            in_specs=[
                pl.BlockSpec((rt, Cp), lambda i: (i, 0)),
                pl.BlockSpec((1, Cp), lambda i: (0, 0)),
                pl.BlockSpec((1, Cp), lambda i: (0, 0)),
                pl.BlockSpec((Cp, Cp), lambda i: (0, 0)),
            ],
            out_specs=pl.BlockSpec((rt, Cp), lambda i: (i, 0)),
        ),
        compiler_params=_CPARAMS,
    )(xp, wp, bp, seg)
    return out.reshape(N, C)


def withbias_layernorm(x, weight, bias, *, row_tile=None):
    """LayerNorm over last dim with affine weight/bias (WithBias_LayerNorm).

    x: (..., C); weight, bias: (C,)
    """
    orig_shape = x.shape
    C = orig_shape[-1]
    x2 = x.reshape(-1, C)
    N = x2.shape[0]
    w32 = weight.astype(jnp.float32)
    b32 = bias.astype(jnp.float32)

    # ---- Lane-dense packed path for small C that divides 128 --------------------
    if C < 128 and 128 % C == 0:
        g = 128 // C
        n_main = (N // g) * g
        if n_main == N and N > 0:
            return _packed_call(x2, w32, b32, g, row_tile).reshape(orig_shape)
        if n_main > 0:
            # Ragged N: keep the lane-dense packed path for the main prefix; only the
            # tiny (< g rows) remainder takes the masked-store row path.
            main = _packed_call(x2[:n_main], w32, b32, g, row_tile)
            rest = _rows_call(x2[n_main:], w32, b32, row_tile=8)
            return jnp.concatenate([main, rest], axis=0).reshape(orig_shape)
        # N < g: fall through to the (tiny) row path.

    # ---- Standard row-tiled path (C >= 128 or non-packable) ---------------------
    # TODO(synk): if the model ever uses C >= 128 with C % 128 != 0 (e.g. 192),
    # output stores become lane-masked; a once-per-model lane-padded layout would help.
    return _rows_call(x2, w32, b32, row_tile).reshape(orig_shape)


def _reference_layernorm(x, weight, bias):
    x32 = x.astype(jnp.float32)
    mu = jnp.mean(x32, axis=-1, keepdims=True)
    var = jnp.mean((x32 - mu) ** 2, axis=-1, keepdims=True)
    y = (x32 - mu) / jnp.sqrt(var + _EPS) * weight.astype(jnp.float32) + bias.astype(jnp.float32)
    return y.astype(x.dtype)


if __name__ == "__main__":
    key = jax.random.PRNGKey(0)
    k0, k1, k2, k3, k4 = jax.random.split(key, 5)

    # 1) Packed lane-dense path (tokens = H*W, C channels); N divisible by 128//C.
    B, S, C = 2, 64, 32
    x = jax.random.normal(k0, (B, S, C), dtype=jnp.float32)
    weight = jnp.ones((C,), dtype=jnp.float32)   # nn.Parameter(torch.ones)
    bias = jnp.zeros((C,), dtype=jnp.float32)    # nn.Parameter(torch.zeros)
    out = jax.block_until_ready(withbias_layernorm(x, weight, bias))
    ref = _reference_layernorm(x, weight, bias)
    assert out.shape == x.shape
    assert jnp.allclose(out, ref, atol=1e-4, rtol=1e-4), "packed path mismatch vs reference"

    # 2) Ragged packed path: N not divisible by 128//C -> packed prefix + tiny row remainder.
    x_rag = jax.random.normal(k1, (1, 67, 32), dtype=jnp.float32)
    w_rag = jax.random.normal(k2, (32,), dtype=jnp.float32)
    b_rag = jax.random.normal(k3, (32,), dtype=jnp.float32)
    out_rag = jax.block_until_ready(withbias_layernorm(x_rag, w_rag, b_rag))
    ref_rag = _reference_layernorm(x_rag, w_rag, b_rag)
    assert jnp.allclose(out_rag, ref_rag, atol=1e-4, rtol=1e-4), "ragged packed path mismatch"

    # 3) Standard (C >= 128) path with a non-divisible row count (cdiv tail).
    x_big = jax.random.normal(k4, (3, 7, 256), dtype=jnp.float32)
    w_big = jax.random.normal(jax.random.PRNGKey(2), (256,), dtype=jnp.float32)
    b_big = jax.random.normal(jax.random.PRNGKey(3), (256,), dtype=jnp.float32)
    out_big = jax.block_until_ready(withbias_layernorm(x_big, w_big, b_big, row_tile=8))
    ref_big = _reference_layernorm(x_big, w_big, b_big)
    assert jnp.allclose(out_big, ref_big, atol=1e-4, rtol=1e-4), "row path mismatch vs reference"

    print("KERNEL_OK")
</pallas_src>

<mosaic_0001>
module attributes {stable_mosaic.version = 11 : i64} {
  func.func @_ln_packed_kernel(%arg0: i32, %arg1: memref<32x128xf32, #tpu.memory_space<vmem>>, %arg2: memref<1x128xf32, #tpu.memory_space<vmem>>, %arg3: memref<1x128xf32, #tpu.memory_space<vmem>>, %arg4: memref<128x128xbf16, #tpu.memory_space<vmem>>, %arg5: memref<32x128xf32, #tpu.memory_space<vmem>>) attributes {dimension_semantics = [#tpu.dimension_semantics<parallel>], iteration_bounds = array<i64: 1>, scalar_prefetch = 0 : i64, scratch_operands = 0 : i64, tpu.core_type = #tpu.core_type<tc>, window_params = [{transform_indices = @transform_0, window_bounds = array<i64: 32, 128>}, {pipeline_mode = #tpu.pipeline_mode<synchronous>, transform_indices = @transform_1, window_bounds = array<i64: 1, 128>}, {pipeline_mode = #tpu.pipeline_mode<synchronous>, transform_indices = @transform_2, window_bounds = array<i64: 1, 128>}, {pipeline_mode = #tpu.pipeline_mode<synchronous>, transform_indices = @transform_3, window_bounds = array<i64: 128, 128>}, {transform_indices = @transform_4, window_bounds = array<i64: 32, 128>}]} {
    %c0 = arith.constant 0 : index
    %c0_0 = arith.constant 0 : index
    %0 = vector.load %arg1[%c0, %c0_0] : memref<32x128xf32, #tpu.memory_space<vmem>>, vector<32x128xf32>
    %c0_1 = arith.constant 0 : index
    %c0_2 = arith.constant 0 : index
    %1 = vector.load %arg4[%c0_1, %c0_2] : memref<128x128xbf16, #tpu.memory_space<vmem>>, vector<128x128xbf16>
    %2 = arith.truncf %0 : vector<32x128xf32> to vector<32x128xbf16>
    %3 = arith.extf %2 : vector<32x128xbf16> to vector<32x128xf32>
    %4 = arith.subf %0, %3 : vector<32x128xf32>
    %5 = arith.truncf %4 : vector<32x128xf32> to vector<32x128xbf16>
    %cst = arith.constant dense<0.000000e+00> : vector<32x128xf32>
    %6 = tpu.matmul %2, %1, %cst {dimension_numbers = #tpu.dot_dimension_numbers<[1], [0], [0], [1], [0, 0, 1, 1], [], []>} : vector<32x128xbf16>, vector<128x128xbf16>, vector<32x128xf32> -> vector<32x128xf32>
    %cst_3 = arith.constant dense<0.000000e+00> : vector<32x128xf32>
    %7 = tpu.matmul %5, %1, %cst_3 {dimension_numbers = #tpu.dot_dimension_numbers<[1], [0], [0], [1], [0, 0, 1, 1], [], []>} : vector<32x128xbf16>, vector<128x128xbf16>, vector<32x128xf32> -> vector<32x128xf32>
    %8 = arith.addf %6, %7 : vector<32x128xf32>
    %cst_4 = arith.constant 3.125000e-02 : f32
    %9 = vector.broadcast %cst_4 : f32 to vector<32x128xf32>
    %10 = arith.mulf %8, %9 : vector<32x128xf32>
    %11 = arith.subf %0, %10 : vector<32x128xf32>
    %12 = arith.mulf %11, %11 : vector<32x128xf32>
    %13 = arith.truncf %12 : vector<32x128xf32> to vector<32x128xbf16>
    %14 = arith.extf %13 : vector<32x128xbf16> to vector<32x128xf32>
    %15 = arith.subf %12, %14 : vector<32x128xf32>
    %16 = arith.truncf %15 : vector<32x128xf32> to vector<32x128xbf16>
    %cst_5 = arith.constant dense<0.000000e+00> : vector<32x128xf32>
    %17 = tpu.matmul %13, %1, %cst_5 {dimension_numbers = #tpu.dot_dimension_numbers<[1], [0], [0], [1], [0, 0, 1, 1], [], []>} : vector<32x128xbf16>, vector<128x128xbf16>, vector<32x128xf32> -> vector<32x128xf32>
    %cst_6 = arith.constant dense<0.000000e+00> : vector<32x128xf32>
    %18 = tpu.matmul %16, %1, %cst_6 {dimension_numbers = #tpu.dot_dimension_numbers<[1], [0], [0], [1], [0, 0, 1, 1], [], []>} : vector<32x128xbf16>, vector<128x128xbf16>, vector<32x128xf32> -> vector<32x128xf32>
    %19 = arith.addf %17, %18 : vector<32x128xf32>
    %cst_7 = arith.constant 3.125000e-02 : f32
    %20 = vector.broadcast %cst_7 : f32 to vector<32x128xf32>
    %21 = arith.mulf %19, %20 : vector<32x128xf32>
    %cst_8 = arith.constant 9.99999974E-6 : f32
    %22 = vector.broadcast %cst_8 : f32 to vector<32x128xf32>
    %23 = arith.addf %21, %22 : vector<32x128xf32>
    %24 = math.rsqrt %23 : vector<32x128xf32>
    %25 = arith.mulf %11, %24 : vector<32x128xf32>
    %c0_9 = arith.constant 0 : index
    %c0_10 = arith.constant 0 : index
    %26 = vector.load %arg2[%c0_9, %c0_10] : memref<1x128xf32, #tpu.memory_space<vmem>>, vector<1x128xf32>
    %27 = vector.broadcast %26 : vector<1x128xf32> to vector<32x128xf32>
    %28 = arith.mulf %25, %27 : vector<32x128xf32>
    %c0_11 = arith.constant 0 : index
    %c0_12 = arith.constant 0 : index
    %29 = vector.load %arg3[%c0_11, %c0_12] : memref<1x128xf32, #tpu.memory_space<vmem>>, vector<1x128xf32>
    %30 = vector.broadcast %29 : vector<1x128xf32> to vector<32x128xf32>
    %31 = arith.addf %28, %30 : vector<32x128xf32>
    %c0_13 = arith.constant 0 : index
    %c0_14 = arith.constant 0 : index
    %32 = vector.load %arg5[%c0_13, %c0_14] : memref<32x128xf32, #tpu.memory_space<vmem>>, vector<32x128xf32>
    tpu.vector_store %arg5[%c0_13, %c0_14], %31 {strides = array<i32>} : memref<32x128xf32, #tpu.memory_space<vmem>>, vector<32x128xf32>,
    return
  }
  func.func @transform_0(%arg0: i32) -> (i32, i32) {
    %c0_i32 = arith.constant 0 : i32
    %c0_i32_0 = arith.constant 0 : i32
    return %arg0, %c0_i32 : i32, i32
  }
  func.func @transform_1(%arg0: i32) -> (i32, i32) {
    %c0_i32 = arith.constant 0 : i32
    %c0_i32_0 = arith.constant 0 : i32
    %c0_i32_1 = arith.constant 0 : i32
    return %c0_i32, %c0_i32_0 : i32, i32
  }
  func.func @transform_2(%arg0: i32) -> (i32, i32) {
    %c0_i32 = arith.constant 0 : i32
    %c0_i32_0 = arith.constant 0 : i32
    %c0_i32_1 = arith.constant 0 : i32
    return %c0_i32, %c0_i32_0 : i32, i32
  }
  func.func @transform_3(%arg0: i32) -> (i32, i32) {
    %c0_i32 = arith.constant 0 : i32
    %c0_i32_0 = arith.constant 0 : i32
    %c0_i32_1 = arith.constant 0 : i32
    return %c0_i32, %c0_i32_0 : i32, i32
  }
  func.func @transform_4(%arg0: i32) -> (i32, i32) {
    %c0_i32 = arith.constant 0 : i32
    %c0_i32_0 = arith.constant 0 : i32
    return %arg0, %c0_i32 : i32, i32
  }
}

</mosaic_0001>

<bundles_post_ra>
// kernel: tpu_custom_call.1
= control target key start
LH: loop header
LB: loop body
LE: loop exit
PB: predicated region body
PF: predicated region fallthrough
CT: control target
= control target key end

     0   :  { %9 = vsyncpa [#allocation3], 0  ;;  %s597_s0 = inlined_call_operand.hbm [shape: f32[32,128], index: 0, kind: input, shape index: {}]   ;;  %s598_s1 = inlined_call_operand.hbm [shape: f32[1,128], index: 1, kind: input, shape index: {}]   ;;  %s599_s2 = inlined_call_operand.vmem [shape: f32[1,128], index: 2, kind: input, shape index: {}]   ;;  %s600_s3 = inlined_call_operand.hbm [shape: bf16[128,128], index: 3, kind: input, shape index: {}]   ;;  %s601_s4 = inlined_call_operand.hbm [shape: f32[32,128], index: 4, kind: output, shape index: {}]  }
   0x1   :  { %10 = vsyncpa [#allocation6], 0  ;;  %s30_s17 = sshll.u32 %s598_s1, 4  ;;  %s31_s17 = int_to_ptr.hbm [resolvable:$true] %s30_s17 }
   0x2   :  { %11 = vsyncpa [#allocation4], 0  ;;  %s523_s18 = smov [#allocation5]   ;;  %s16_s22 = sshll.u32 %s597_s0, 4  ;;  %s17_s22 = int_to_ptr.hbm [resolvable:$true] %s16_s22 }
   0x3   :  { %s32_s19 = sshll.u32 %s523_s18, 4  ;;  %s524_s23 = smov [#allocation2]   ;;  %s33_s19 = int_to_ptr.vmem [resolvable:$true] %s32_s19 }
   0x4   :  { %35 = dma.hbm_to_vmem [thread:$0]  %s31_s17, 16, %s33_s19, [#allocation6]  }
   0x5   :  { %s18_s24 = sshll.u32 %s524_s23, 4  ;;  %s525_s25 = smov 128   ;;  %s19_s24 = int_to_ptr.vmem [resolvable:$true] %s18_s24 }
   0x6   :  { %s526_s26 = smov 8   ;;  %s42_s28 = sshll.u32 %s600_s3, 4  ;;  %s43_s28 = int_to_ptr.hbm [resolvable:$true] %s42_s28 }
   0x7   :  { %24 = dma.hbm_to_vmem [thread:$0]  %s17_s22, 512, %s19_s24, [#allocation3], %s525_s25, %s525_s25, %s526_s26  }
   0x8   :  { %s527_s29 = smov [#allocation7]   ;;  %s528_s0 = smov 64  }
   0x9   :  { %s44_s30 = sshll.u32 %s527_s29, 4  ;;  %s529_s5 = smov 4   ;;  %s45_s30 = int_to_ptr.vmem [resolvable:$true] %s44_s30 }
   0xa   :  { %50 = dma.hbm_to_vmem [thread:$0]  %s43_s28, 1024, %s45_s30, [#allocation6], %s528_s0, %s528_s0, %s529_s5  }
   0xb   :  { %517 = dma.done.wait [#allocation3], 512  }
   0xc   :  { %518 = vsyncadd [#allocation3], 4294966784 }
   0xd   :  { %519 = dma.done.wait [#allocation6], 1040  }
   0xe   :  { %520 = vsyncadd [#allocation6], 4294966256  ;;  %v402_v0 = vld [vmem:[#allocation7 + $0x38] sm:$0xff]  ;;  %v401_v1 = vld [vmem:[#allocation7 + $0x30] sm:$0xff]  ;;  %s349_s10 = sshll.u32 %s601_s4, 4  ;;  %s350_s10 = int_to_ptr.hbm [resolvable:$true] %s349_s10 }
   0xf   :  { %145 = vmatpush.bf16.msra.mxu0 %v402_v0  ;;  %176 = vmatpush.bf16.msra.mxu1 %v402_v0  ;;  %v400_v2 = vld [vmem:[#allocation7 + $0x28] sm:$0xff]  ;;  %v399_v3 = vld [vmem:[#allocation7 + $0x20] sm:$0xff]  ;;  %v398_v4 = vld [vmem:[#allocation7 + $0x18] sm:$0xff] }
  0x10   :  { %252 = vmatpush.bf16.msra.mxu3 %v402_v0  ;;  %221 = vmatpush.bf16.msra.mxu2 %v402_v0  ;;  %v63_v5 = vld [vmem:[#allocation2] sm:$0xff]  ;;  %v64_v6 = vld [vmem:[#allocation2 + $0x8] sm:$0xff]  ;;  %v397_v9 = vld [vmem:[#allocation7 + $0x10] sm:$0xff] }
  0x11   :  { %v83_v7 = vpack.c.bf16 %v63_v5, %v63_v5  ;;  %v84_v8 = vpack.c.bf16 %v64_v6, %v64_v6  ;;  %v396_v12 = vld [vmem:[#allocation7 + $0x8] sm:$0xff]  ;;  %v395_v17 = vld [vmem:[#allocation7] sm:$0xff]  ;;  %v66_v21 = vld [vmem:[#allocation2 + $0x18] sm:$0xff] }
  0x12   :  { %v65_v20 = vld [vmem:[#allocation2 + $0x10] sm:$0xff]  ;;  %v86_v23 = vpack.c.bf16 %v66_v21, %v66_v21 }
  0x13   :  { %146 = vmatpush.bf16.msra.mxu0 %v401_v1  ;;  %177 = vmatpush.bf16.msra.mxu1 %v401_v1  ;;  %v87_v10 = vunpack.c.l.bf16 %v83_v7  ;;  %v88_v11 = vunpack.c.l.bf16 %v84_v8  ;;  %v168_v15 = vunpack.c.l.b16 %v83_v7  ;;  %v169_v16 = vunpack.c.l.b16 %v84_v8 }
  0x14   :  { %253 = vmatpush.bf16.msra.mxu3 %v401_v1  ;;  %222 = vmatpush.bf16.msra.mxu2 %v401_v1  ;;  %v85_v22 = vpack.c.bf16 %v65_v20, %v65_v20  ;;  %v90_v25 = vunpack.c.l.bf16 %v86_v23  ;;  %v171_v29 = vunpack.c.l.b16 %v86_v23 }
  0x15   :  { %v91_v13 = vsub.f32 %v63_v5, %v87_v10  ;;  %v92_v14 = vsub.f32 %v64_v6, %v88_v11  ;;  %v172_v19 = vpack.c.b16 %v169_v16, %v168_v15 }
  0x16   :  { %v89_v24 = vunpack.c.l.bf16 %v85_v22  ;;  %v94_v27 = vsub.f32 %v66_v21, %v90_v25  ;;  %v170_v28 = vunpack.c.l.b16 %v85_v22 }
  0x17   :  { %147 = vmatpush.bf16.msra.mxu0 %v400_v2  ;;  %178 = vmatpush.bf16.msra.mxu1 %v400_v2  ;;  %v95_v18 = vpack.c.bf16 %v92_v14, %v91_v13 }
  0x18   :  { %254 = vmatpush.bf16.msra.mxu3 %v400_v2  ;;  %223 = vmatpush.bf16.msra.mxu2 %v400_v2  ;;  %v93_v26 = vsub.f32 %v65_v20, %v89_v24  ;;  %v173_v31 = vpack.c.b16 %v171_v29, %v170_v28 }
  0x1a   :  { %v96_v30 = vpack.c.bf16 %v94_v27, %v93_v26 }
  0x1b   :  { %148 = vmatpush.bf16.msra.mxu0 %v399_v3  ;;  %179 = vmatpush.bf16.msra.mxu1 %v399_v3 }
  0x1c   :  { %255 = vmatpush.bf16.msra.mxu3 %v399_v3  ;;  %224 = vmatpush.bf16.msra.mxu2 %v399_v3 }
  0x1f   :  { %149 = vmatpush.bf16.msra.mxu0 %v398_v4  ;;  %180 = vmatpush.bf16.msra.mxu1 %v398_v4 }
  0x20   :  { %256 = vmatpush.bf16.msra.mxu3 %v398_v4  ;;  %225 = vmatpush.bf16.msra.mxu2 %v398_v4 }
  0x23   :  { %150 = vmatpush.bf16.msra.mxu0 %v397_v9  ;;  %181 = vmatpush.bf16.msra.mxu1 %v397_v9 }
  0x24   :  { %257 = vmatpush.bf16.msra.mxu3 %v397_v9  ;;  %226 = vmatpush.bf16.msra.mxu2 %v397_v9 }
  0x27   :  { %151 = vmatpush.bf16.msra.mxu0 %v396_v12  ;;  %182 = vmatpush.bf16.msra.mxu1 %v396_v12 }
  0x28   :  { %258 = vmatpush.bf16.msra.mxu3 %v396_v12  ;;  %227 = vmatpush.bf16.msra.mxu2 %v396_v12 }
  0x2b   :  { %152 = vmatpush.bf16.msra.mxu0 %v395_v17  ;;  %183 = vmatpush.bf16.msra.mxu1 %v395_v17 }
  0x2c   :  { %259 = vmatpush.bf16.msra.mxu3 %v395_v17  ;;  %228 = vmatpush.bf16.msra.mxu2 %v395_v17 }
  0x2e   :  { %153 = vmatmul.bf16.vlgmr.msra.gmra.mxu0 %v95_v18  ;;  %184 = vmatmul.bf16.vlgmr.msra.gmra.mxu1 %v172_v19 }
  0x3e   :  { %158 = vmatmul.bf16.gmra.mxu0 %v96_v30  ;;  %189 = vmatmul.bf16.gmra.mxu1 %v173_v31 }
  0xab   :  { %v154_v32 = vpop.f32.mrf.mxu0  ;;  %v185_v33 = vpop.f32.mrf.mxu1 }
  0xac   :  { %v186_v34 = vadd.f32 %v185_v33, %v154_v32 }
  0xae   :  { %v195_v35 = vmul.f32 0.03125, %v186_v34 }
  0xb0   :  { %v568_v36 = vsub.f32 %v63_v5, %v195_v35  ;;  %v411_v35 = vld [vmem:[#allocation5] ss:$0 sm:$0xff] }
  0xb2   :  { %v203_v39 = vmul.f32 %v568_v36, %v568_v36 }
  0xb3   :  { %v156_v37 = vpop.f32.mrf.mxu0  ;;  %v187_v38 = vpop.f32.mrf.mxu1 }
  0xb4   :  { %v188_v40 = vadd.f32 %v187_v38, %v156_v37  ;;  %v207_v43 = vpack.c.bf16 %v203_v39, %v203_v39 }
  0xb6   :  { %v196_v41 = vmul.f32 0.03125, %v188_v40  ;;  %v211_v49 = vunpack.c.l.bf16 %v207_v43  ;;  %v244_v51 = vunpack.c.l.b16 %v207_v43 }
  0xb8   :  { %v572_v42 = vsub.f32 %v64_v6, %v196_v41  ;;  %v215_v56 = vsub.f32 %v203_v39, %v211_v49 }
  0xba   :  { %v204_v44 = vmul.f32 %v572_v42, %v572_v42 }
  0xbb   :  { %v159_v45 = vpop.f32.mrf.mxu0  ;;  %v190_v46 = vpop.f32.mrf.mxu1 }
  0xbc   :  { %v191_v47 = vadd.f32 %v190_v46, %v159_v45  ;;  %v208_v48 = vpack.c.bf16 %v204_v44, %v204_v44 }
  0xbe   :  { %v197_v50 = vmul.f32 0.03125, %v191_v47  ;;  %v245_v52 = vunpack.c.l.b16 %v208_v48  ;;  %v212_v53 = vunpack.c.l.bf16 %v208_v48 }
  0xc0   :  { %v576_v54 = vsub.f32 %v65_v20, %v197_v50  ;;  %v248_v55 = vpack.c.b16 %v245_v52, %v244_v51  ;;  %v216_v57 = vsub.f32 %v204_v44, %v212_v53  ;;  %v412_v44 = vld [vmem:[%s599_s2] ss:$0 sm:$0xff]  ;;  %s530_s2 = smov [#allocation8]  }
  0xc1   :  { %s347_s7 = sshll.u32 %s530_s2, 4  ;;  %s348_s7 = int_to_ptr.vmem [resolvable:$true] %s347_s7 }
  0xc2   :  { %260 = vmatmul.bf16.vlgmr.msra.gmra.mxu3 %v248_v55  ;;  %v219_v58 = vpack.c.bf16 %v216_v57, %v215_v56  ;;  %v205_v61 = vmul.f32 %v576_v54, %v576_v54 }
  0xc3   :  { %v161_v59 = vpop.f32.mrf.mxu0  ;;  %v192_v60 = vpop.f32.mrf.mxu1 }
  0xc4   :  { %v193_v62 = vadd.f32 %v192_v60, %v161_v59  ;;  %229 = vmatmul.bf16.vlgmr.msra.gmra.mxu2 %v219_v58  ;;  %v209_v1 = vpack.c.bf16 %v205_v61, %v205_v61 }
  0xc6   :  { %v198_v63 = vmul.f32 0.03125, %v193_v62  ;;  %v213_v4 = vunpack.c.l.bf16 %v209_v1  ;;  %v246_v5 = vunpack.c.l.b16 %v209_v1 }
  0xc8   :  { %v580_v0 = vsub.f32 %v66_v21, %v198_v63  ;;  %v217_v9 = vsub.f32 %v205_v61, %v213_v4 }
  0xca   :  { %v206_v2 = vmul.f32 %v580_v0, %v580_v0 }
  0xcc   :  { %v210_v3 = vpack.c.bf16 %v206_v2, %v206_v2 }
  0xce   :  { %v247_v6 = vunpack.c.l.b16 %v210_v3  ;;  %v214_v7 = vunpack.c.l.bf16 %v210_v3 }
  0xd0   :  { %v249_v8 = vpack.c.b16 %v247_v6, %v246_v5  ;;  %v218_v10 = vsub.f32 %v206_v2, %v214_v7 }
  0xd2   :  { %265 = vmatmul.bf16.gmra.mxu3 %v249_v8  ;;  %v220_v11 = vpack.c.bf16 %v218_v10, %v217_v9 }
  0xd4   :  { %234 = vmatmul.bf16.gmra.mxu2 %v220_v11 }
 0x145   :  { %v261_v12 = vpop.f32.mrf.mxu3 }
 0x147   :  { %v230_v13 = vpop.f32.mrf.mxu2 }
 0x148   :  { %v262_v14 = vadd.f32 %v261_v12, %v230_v13 }
 0x14a   :  { %v271_v15 = vmul.f32 0.03125, %v262_v14 }
 0x14c   :  { %v275_v16 = vadd.f32 1e-05, %v271_v15 }
 0x14d   :  { %v263_v17 = vpop.f32.mrf.mxu3 }
 0x14e   :  { %413 = vrsqrt.f32 %v275_v16  ;;  %vm285_vm1 = vweird.f32 %v275_v16 }
 0x14f   :  { %v232_v18 = vpop.f32.mrf.mxu2 }
 0x150   :  { %v264_v19 = vadd.f32 %v263_v17, %v232_v18 }
 0x152   :  { %v272_v20 = vmul.f32 0.03125, %v264_v19 }
 0x154   :  { %v414_v21 = vpop.eup %413  ;;  %v276_v22 = vadd.f32 1e-05, %v272_v20 }
 0x155   :  { %v280_v23 = vmul.f32 %v414_v21, %v275_v16  ;;  %v266_v24 = vpop.f32.mrf.mxu3  ;;  %vm286_vm0 = vweird.f32 %v414_v21 }
 0x156   :  { %415 = vrsqrt.f32 %v276_v22  ;;  %vm287_vm2 = vmor %vm285_vm1, %vm286_vm0  ;;  %vm295_vm4 = vweird.f32 %v276_v22 }
 0x157   :  { %v281_v25 = vmul.f32 %v414_v21, %v280_v23  ;;  %v235_v26 = vpop.f32.mrf.mxu2 }
 0x158   :  { %v267_v27 = vadd.f32 %v266_v24, %v235_v26 }
 0x159   :  { %v282_v28 = vmul.f32 0.5, %v281_v25 }
 0x15a   :  { %v273_v29 = vmul.f32 0.03125, %v267_v27 }
 0x15b   :  { %v283_v30 = vsub.f32 1.5, %v282_v28 }
 0x15c   :  { %v416_v31 = vpop.eup %415  ;;  %v277_v32 = vadd.f32 1e-05, %v273_v29 }
 0x15d   :  { %v284_v33 = vmul.f32 %v414_v21, %v283_v30  ;;  %v290_v34 = vmul.f32 %v416_v31, %v276_v22  ;;  %v268_v39 = vpop.f32.mrf.mxu3  ;;  %vm296_vm3 = vweird.f32 %v416_v31 }
 0x15e   :  { %417 = vrsqrt.f32 %v277_v32  ;;  %vm297_vm5 = vmor %vm295_vm4, %vm296_vm3  ;;  %vm305_vm7 = vweird.f32 %v277_v32 }
 0x15f   :  { %v288_v37 = vsel %vm287_vm2, %v414_v21, %v284_v33  ;;  %v291_v38 = vmul.f32 %v416_v31, %v290_v34  ;;  %v237_v40 = vpop.f32.mrf.mxu2 }
 0x160   :  { %v319_v41 = vmul.f32 %v288_v37, %v568_v36  ;;  %v269_v43 = vadd.f32 %v268_v39, %v237_v40 }
 0x161   :  { %v292_v45 = vmul.f32 0.5, %v291_v38 }
 0x162   :  { %v327_v46 = vmul.f32 %v411_v35, %v319_v41  ;;  %v274_v47 = vmul.f32 0.03125, %v269_v43 }
 0x163   :  { %v293_v48 = vsub.f32 1.5, %v292_v45 }
 0x164   :  { %v418_v49 = vpop.eup %417  ;;  %v278_v50 = vadd.f32 1e-05, %v274_v47  ;;  %v335_v51 = vadd.f32 %v412_v44, %v327_v46 }
 0x165   :  { %v294_v52 = vmul.f32 %v416_v31, %v293_v48  ;;  %v300_v53 = vmul.f32 %v418_v49, %v277_v32  ;;  %vm306_vm6 = vweird.f32 %v418_v49 }
 0x166   :  { %419 = vrsqrt.f32 %v278_v50  ;;  %339 = vst [vmem:[#allocation8] sm:$0xff] %v335_v51  ;;  %vm307_vm8 = vmor %vm305_vm7, %vm306_vm6  ;;  %vm315_vm10 = vweird.f32 %v278_v50 }
 0x167   :  { %v298_v36 = vsel %vm297_vm5, %v416_v31, %v294_v52  ;;  %v301_v55 = vmul.f32 %v418_v49, %v300_v53 }
 0x168   :  { %v320_v56 = vmul.f32 %v298_v36, %v572_v42 }
 0x169   :  { %v302_v57 = vmul.f32 0.5, %v301_v55 }
 0x16a   :  { %v328_v58 = vmul.f32 %v411_v35, %v320_v56 }
 0x16b   :  { %v303_v59 = vsub.f32 1.5, %v302_v57 }
 0x16c   :  { %v420_v60 = vpop.eup %419  ;;  %v336_v61 = vadd.f32 %v412_v44, %v328_v58 }
 0x16d   :  { %v304_v62 = vmul.f32 %v418_v49, %v303_v59  ;;  %v310_v63 = vmul.f32 %v420_v60, %v278_v50  ;;  %vm316_vm9 = vweird.f32 %v420_v60 }
 0x16e   :  { %340 = vst [vmem:[#allocation8 + $0x8] sm:$0xff] %v336_v61  ;;  %vm317_vm11 = vmor %vm315_vm10, %vm316_vm9 }
 0x16f   :  { %v308_v1 = vsel %vm307_vm8, %v418_v49, %v304_v62  ;;  %v311_v2 = vmul.f32 %v420_v60, %v310_v63 }
 0x170   :  { %v321_v3 = vmul.f32 %v308_v1, %v576_v54 }
 0x171   :  { %v312_v4 = vmul.f32 0.5, %v311_v2 }
 0x172   :  { %v329_v5 = vmul.f32 %v411_v35, %v321_v3 }
 0x173   :  { %v313_v6 = vsub.f32 1.5, %v312_v4 }
 0x174   :  { %v337_v42 = vadd.f32 %v412_v44, %v329_v5 }
 0x175   :  { %v314_v7 = vmul.f32 %v420_v60, %v313_v6 }
 0x176   :  { %341 = vst [vmem:[#allocation8 + $0x10] sm:$0xff] %v337_v42 }
 0x177   :  { %v318_v8 = vsel %vm317_vm11, %v420_v60, %v314_v7 }
 0x178   :  { %v322_v9 = vmul.f32 %v318_v8, %v580_v0 }
 0x17a   :  { %v330_v10 = vmul.f32 %v411_v35, %v322_v9 }
 0x17c   :  { %v338_v54 = vadd.f32 %v412_v44, %v330_v10 }
 0x17e   :  { %342 = vst [vmem:[#allocation8 + $0x18] sm:$0xff] %v338_v54 }
 0x17f   :  { %355 = dma.vmem_to_hbm [thread:$0]  %s348_s7, 512, %s350_s10, [#allocation4], %s525_s25, %s525_s25, %s526_s26  }
 0x180   :  { %521 = dma.done.wait [#allocation4], 512  }
 0x181   :  { %522 = vsyncadd [#allocation4], 4294966784 }
 0x182   :  { %360 = vsyncpa [#allocation3], 1 }
 0x183   :  { %361 = vsyncpa [#allocation6], 1 }
 0x184   :  { %362 = vsyncpa [#allocation4], 1 }

</bundles_post_ra>
